<compile_context>
chip_gen: v7x
topology: tpu7x:2x2x1
jax: 0.10.0
libtpu: 0.0.40
codegen_flags: <defaults>
</compile_context>

<pallas_src>
import jax
import jax.numpy as jnp
from jax.experimental import pallas as pl
from jax.experimental.pallas import tpu as pltpu


# ---------------------------------------------------------------------------
# Kernel
# ---------------------------------------------------------------------------

def _film_fused_kernel(x_ref, cond_ref, w_ref, b_ref, out_ref):
    """One fused MXU matmul per grid step.

    w_ref holds an interleaved [Hp, 2*tn] block == [Wg_blk_j | Wb_blk_j];
    gb = cond @ w + b is split at the (128-aligned) midpoint into gamma / beta.
    """
    tn = out_ref.shape[-1]
    cond = cond_ref[...].astype(w_ref.dtype)      # no-op when cond cast at boundary
    gb = jnp.dot(cond, w_ref[...], preferred_element_type=jnp.float32)
    gb = gb + b_ref[...].astype(jnp.float32)
    gamma = gb[:, :tn]
    beta = gb[:, tn:]
    out_ref[...] = (x_ref[...].astype(jnp.float32) * gamma + beta).astype(out_ref.dtype)


# ---------------------------------------------------------------------------
# Hardware / sizing helpers
# ---------------------------------------------------------------------------

def _round_up(v, m):
    return ((v + m - 1) // m) * m


def _vmem_capacity_bytes():
    try:
        return int(pltpu.get_tpu_info().vmem_capacity_bytes)
    except Exception:
        return 64 << 20  # conservative: v7x per-TensorCore VMEM


def _vmem_budget_bytes():
    # ~0.8 of physical minus fixed headroom for Mosaic internal scratch.
    return int(0.8 * _vmem_capacity_bytes()) - (8 << 20)


def _vmem_limit(est_bytes, frac=0.8):
    cap = _vmem_capacity_bytes()
    return min(max(est_bytes + (8 << 20), 32 << 20), int(frac * cap))


def _default_tn(hp, wbytes):
    """Pick the output-hidden interleave/tile width from the VMEM generation."""
    budget = max(_vmem_budget_bytes(), 16 << 20)
    # Resident full fused weight (single copy) should leave >= half the budget
    # for activations and f32 intermediates.
    if hp * 2 * hp * wbytes <= budget // 2:
        return hp
    # Otherwise tile the output-hidden axis; prefer >=256-wide blocks
    # (v6e/v7x MXU is 2x256^2), only fall to 128 when forced (v5e / huge H).
    for cand in (512, 256, 128):
        if hp % cand == 0 and 2 * hp * 2 * cand * wbytes <= budget // 3:
            return cand
    return 128


# ---------------------------------------------------------------------------
# Parameter preprocessing (ONE-TIME, outside the per-call hot path)
# ---------------------------------------------------------------------------

def prepare_film_params(wg, bg, wb, bb, *, weight_dtype=jnp.bfloat16, tn=None):
    """wg, wb: [H, H] nn.Linear layout ([out, in]); bg, bb: [H].

    Returns (w_cat, b_cat, tn) where
      w_cat: [Hp, 2*Hp]  column blocks [Wg.T_blk0 | Wb.T_blk0 | Wg.T_blk1 | ...]
      b_cat: [1, 2*Hp]   same interleaving of [bg | bb]
      tn:    interleave block width (multiple of 128, divides Hp)
    Hp = H rounded up to a multiple of 128 (zero padded).  weight_dtype=bf16 by
    default so the MXU runs at native rate and weight HBM/VMEM is halved;
    pass jnp.float32 (or None) to keep full-precision weights for validation.
    """
    h = wg.shape[0]
    assert wg.shape == (h, h) and wb.shape == (h, h)
    assert bg.shape == (h,) and bb.shape == (h,)
    hp = _round_up(h, 128)
    wdt = jnp.dtype(weight_dtype) if weight_dtype is not None else jnp.dtype(wg.dtype)

    def prep_w(w):  # [H,H] torch [out,in] -> padded [Hp,Hp] in [in,out] layout
        wt = w.T
        if hp != h:
            wt = jnp.pad(wt, ((0, hp - h), (0, hp - h)))
        return wt.astype(wdt)

    def prep_b(b):
        if hp != h:
            b = jnp.pad(b, (0, hp - h))
        return b.astype(jnp.float32)  # bias added post-matmul in f32 (tiny)

    wg_t, wb_t = prep_w(wg), prep_w(wb)
    bg_p, bb_p = prep_b(bg), prep_b(bb)

    if tn is None:
        tn = _default_tn(hp, wdt.itemsize)
    assert hp % tn == 0 and tn % 128 == 0, (hp, tn)

    nblk = hp // tn
    w_cat = jnp.stack(
        [wg_t.reshape(hp, nblk, tn), wb_t.reshape(hp, nblk, tn)], axis=2
    ).reshape(hp, 2 * hp)
    b_cat = jnp.stack(
        [bg_p.reshape(nblk, tn), bb_p.reshape(nblk, tn)], axis=1
    ).reshape(1, 2 * hp)
    return w_cat, b_cat, tn


# ---------------------------------------------------------------------------
# Wrapper
# ---------------------------------------------------------------------------

def film_gate(x, cond, w_cat, b_cat, tn, *, tb=None):
    """out = x * (cond @ Wg.T + bg) + (cond @ Wb.T + bb)

    x, cond: [B, H]; (w_cat, b_cat, tn) from prepare_film_params.
    """
    B, H = x.shape
    assert cond.shape == (B, H)
    Hp = w_cat.shape[0]
    assert w_cat.shape == (Hp, 2 * Hp) and b_cat.shape == (1, 2 * Hp)
    assert Hp % tn == 0 and tn % 128 == 0 and Hp >= H
    nn_ = Hp // tn
    out_dtype = x.dtype

    # Feed cond at the weight dtype (bf16 by default): halves its HBM traffic
    # and keeps the MXU at native rate; accumulation stays f32 in-kernel.
    cond_in = cond.astype(w_cat.dtype)
    x_in = x
    if Hp != H:
        # Pad once in the wrapper so the kernel's output stores are lane-dense.
        x_in = jnp.pad(x_in, ((0, 0), (0, Hp - H)))
        cond_in = jnp.pad(cond_in, ((0, 0), (0, Hp - H)))

    budget = max(_vmem_budget_bytes(), 16 << 20)
    xbytes = jnp.dtype(out_dtype).itemsize
    cbytes = cond_in.dtype.itemsize
    wbytes = w_cat.dtype.itemsize
    w_bufs = 1 if nn_ == 1 else 2  # resident weight is single-buffered

    def vmem_est(tb_, wb_):
        act = 2 * tb_ * tn * xbytes          # x  (double-buffered)
        act += 2 * tb_ * tn * xbytes         # out
        act += 2 * tb_ * Hp * cbytes         # cond (full K)
        wgt = wb_ * (Hp * 2 * tn * wbytes + 2 * tn * 4)
        tmp = tb_ * 2 * tn * 4 + 3 * tb_ * tn * 4   # f32 gb + upcasts/products
        return act + wgt + tmp

    if tb is None:
        # Keep at least two batch blocks so both v7x TensorCores get work.
        tb = min(512, _round_up(pl.cdiv(B, 2), 8))
    tb = min(tb, _round_up(B, 8))
    tb = max(8, (tb // 8) * 8)
    while tb > 8 and vmem_est(tb, w_bufs) > budget:
        tb = max(8, ((tb // 2) // 8) * 8)
    if B < tb:
        tb = B  # single partial block: full-dim block satisfies the (8,128) rule
    nb = pl.cdiv(B, tb)
    # TODO(synk): add a K-tiled (reduction over Hp with a VMEM f32 accumulator)
    # variant for very large Hp where the full-K cond block alone busts the budget.

    est = vmem_est(tb, w_bufs)

    common = dict(
        out_shape=jax.ShapeDtypeStruct((B, Hp), out_dtype),
        grid=(nn_, nb),
        out_specs=pl.BlockSpec((tb, tn), lambda j, i: (i, j)),
    )

    def build_in_specs(single_buffer_weights):
        wkw = dict(pipeline_mode=pl.Buffered(1)) if single_buffer_weights else {}
        return [
            pl.BlockSpec((tb, tn), lambda j, i: (i, j)),            # x column tile
            pl.BlockSpec((tb, Hp), lambda j, i: (i, 0)),            # cond (full K)
            pl.BlockSpec((Hp, 2 * tn), lambda j, i: (0, j), **wkw),  # fused weight blk
            pl.BlockSpec((1, 2 * tn), lambda j, i: (0, j), **wkw),   # fused bias blk
        ]

    def call(single_buffer_weights, limit):
        return pl.pallas_call(
            _film_fused_kernel,
            in_specs=build_in_specs(single_buffer_weights),
            compiler_params=pltpu.CompilerParams(
                dimension_semantics=("parallel", "parallel"),
                vmem_limit_bytes=limit,
            ),
            **common,
        )(x_in, cond_in, w_cat, b_cat)

    if nn_ == 1:
        # Weight/bias index_map is constant across the whole grid -> keep one
        # resident copy (Buffered(1)); fall back to default double-buffering if
        # pipeline_mode is unsupported on this jax version.
        try:
            out = call(True, _vmem_limit(est, 0.8))
        except Exception:
            out = call(False, _vmem_limit(vmem_est(tb, 2), 0.85))
    else:
        out = call(False, _vmem_limit(est, 0.8))

    return out if Hp == H else out[:, :H]


# ---------------------------------------------------------------------------
# Demo / correctness check
# ---------------------------------------------------------------------------

def _reference(x, cond, wg, bg, wb, bb):
    gamma = cond @ wg.T + bg
    beta = cond @ wb.T + bb
    return x * gamma + beta


def _init_linear(key, hidden):
    """Deterministic nn.Linear-style init: U(-1/sqrt(H), 1/sqrt(H))."""
    kw, kb = jax.random.split(key)
    bound = 1.0 / jnp.sqrt(hidden)
    w = jax.random.uniform(kw, (hidden, hidden), jnp.float32, -bound, bound)
    b = jax.random.uniform(kb, (hidden,), jnp.float32, -bound, bound)
    return w, b


if __name__ == "__main__":
    key = jax.random.PRNGKey(0)

    def run_case(batch, hidden, *, weight_dtype=jnp.float32, tn=None, tb=None,
                 atol=2e-5, rtol=2e-5):
        k = jax.random.fold_in(key, batch * 1000 + hidden)
        k_x, k_c, k_g, k_b = jax.random.split(k, 4)
        x = jax.random.normal(k_x, (batch, hidden), jnp.float32)
        cond = jax.random.normal(k_c, (batch, hidden), jnp.float32)
        wg, bg = _init_linear(k_g, hidden)
        wb, bb = _init_linear(k_b, hidden)
        # One-time parameter prep (outside the hot path).
        w_cat, b_cat, tn_sel = prepare_film_params(
            wg, bg, wb, bb, weight_dtype=weight_dtype, tn=tn)
        out = jax.block_until_ready(film_gate(x, cond, w_cat, b_cat, tn_sel, tb=tb))
        ref = _reference(x, cond, wg, bg, wb, bb)
        assert out.shape == ref.shape
        assert jnp.allclose(out, ref, atol=atol, rtol=rtol), (
            f"mismatch at batch={batch} hidden={hidden} "
            f"dtype={weight_dtype} tn={tn_sel} "
            f"maxerr={float(jnp.max(jnp.abs(out - ref)))}")

    # Toy module shape (H=32): padded-to-128 path, resident weight, one grid step.
    run_case(8, 32)
    # Resident fused weight, batch grid of 2 (pipelined x/cond/out tiles).
    run_case(16, 128, tb=8)
    # Interleaved column-tiled path (large-H / v7x-style tiling), grid = (2, 2).
    run_case(16, 256, tn=128, tb=8)
    # Default bf16 MXU path (weights + cond in bf16, f32 accumulation).
    run_case(16, 128, weight_dtype=jnp.bfloat16, tb=8, atol=5e-2, rtol=5e-2)

    print("KERNEL_OK")
</pallas_src>

<mosaic_0001>
module attributes {stable_mosaic.version = 11 : i64} {
  func.func @_film_fused_kernel(%arg0: i32, %arg1: i32, %arg2: memref<8x128xf32, #tpu.memory_space<vmem>>, %arg3: memref<8x128xf32, #tpu.memory_space<vmem>>, %arg4: memref<128x256xf32, #tpu.memory_space<vmem>>, %arg5: memref<1x256xf32, #tpu.memory_space<vmem>>, %arg6: memref<8x128xf32, #tpu.memory_space<vmem>>) attributes {dimension_semantics = [#tpu.dimension_semantics<parallel>, #tpu.dimension_semantics<parallel>], iteration_bounds = array<i64: 1, 1>, scalar_prefetch = 0 : i64, scratch_operands = 0 : i64, tpu.core_type = #tpu.core_type<tc>, window_params = [{transform_indices = @transform_0, window_bounds = array<i64: 8, 128>}, {transform_indices = @transform_1, window_bounds = array<i64: 8, 128>}, {pipeline_mode = #tpu.pipeline_mode<synchronous>, transform_indices = @transform_2, window_bounds = array<i64: 128, 256>}, {pipeline_mode = #tpu.pipeline_mode<synchronous>, transform_indices = @transform_3, window_bounds = array<i64: 1, 256>}, {transform_indices = @transform_4, window_bounds = array<i64: 8, 128>}]} {
    %c0 = arith.constant 0 : index
    %c0_0 = arith.constant 0 : index
    %0 = vector.load %arg3[%c0, %c0_0] : memref<8x128xf32, #tpu.memory_space<vmem>>, vector<8x128xf32>
    %c0_1 = arith.constant 0 : index
    %c0_2 = arith.constant 0 : index
    %1 = vector.load %arg4[%c0_1, %c0_2] : memref<128x256xf32, #tpu.memory_space<vmem>>, vector<128x256xf32>
    %cst = arith.constant dense<0.000000e+00> : vector<8x256xf32>
    %2 = tpu.matmul %0, %1, %cst {dimension_numbers = #tpu.dot_dimension_numbers<[1], [0], [0], [1], [0, 0, 1, 1], [], []>} : vector<8x128xf32>, vector<128x256xf32>, vector<8x256xf32> -> vector<8x256xf32>
    %c0_3 = arith.constant 0 : index
    %c0_4 = arith.constant 0 : index
    %3 = vector.load %arg5[%c0_3, %c0_4] : memref<1x256xf32, #tpu.memory_space<vmem>>, vector<1x256xf32>
    %4 = vector.broadcast %3 : vector<1x256xf32> to vector<8x256xf32>
    %5 = arith.addf %2, %4 : vector<8x256xf32>
    %6 = vector.extract_strided_slice %5 {offsets = [0, 0], sizes = [8, 128], strides = [1, 1]} : vector<8x256xf32> to vector<8x128xf32>
    %7 = vector.extract_strided_slice %5 {offsets = [0, 128], sizes = [8, 128], strides = [1, 1]} : vector<8x256xf32> to vector<8x128xf32>
    %c0_5 = arith.constant 0 : index
    %c0_6 = arith.constant 0 : index
    %8 = vector.load %arg2[%c0_5, %c0_6] : memref<8x128xf32, #tpu.memory_space<vmem>>, vector<8x128xf32>
    %9 = arith.mulf %8, %6 : vector<8x128xf32>
    %10 = arith.addf %9, %7 : vector<8x128xf32>
    %c0_7 = arith.constant 0 : index
    %c0_8 = arith.constant 0 : index
    %11 = vector.load %arg6[%c0_7, %c0_8] : memref<8x128xf32, #tpu.memory_space<vmem>>, vector<8x128xf32>
    tpu.vector_store %arg6[%c0_7, %c0_8], %10 {strides = array<i32>} : memref<8x128xf32, #tpu.memory_space<vmem>>, vector<8x128xf32>,
    return
  }
  func.func @transform_0(%arg0: i32, %arg1: i32) -> (i32, i32) {
    %c0_i32 = arith.constant 0 : i32
    return %arg1, %arg0 : i32, i32
  }
  func.func @transform_1(%arg0: i32, %arg1: i32) -> (i32, i32) {
    %c0_i32 = arith.constant 0 : i32
    %c0_i32_0 = arith.constant 0 : i32
    return %arg1, %c0_i32 : i32, i32
  }
  func.func @transform_2(%arg0: i32, %arg1: i32) -> (i32, i32) {
    %c0_i32 = arith.constant 0 : i32
    %c0_i32_0 = arith.constant 0 : i32
    return %c0_i32, %arg0 : i32, i32
  }
  func.func @transform_3(%arg0: i32, %arg1: i32) -> (i32, i32) {
    %c0_i32 = arith.constant 0 : i32
    %c0_i32_0 = arith.constant 0 : i32
    return %c0_i32, %arg0 : i32, i32
  }
  func.func @transform_4(%arg0: i32, %arg1: i32) -> (i32, i32) {
    %c0_i32 = arith.constant 0 : i32
    return %arg1, %arg0 : i32, i32
  }
}

module attributes {stable_mosaic.version = 11 : i64} {
  func.func @_film_fused_kernel(%arg0: i32, %arg1: i32, %arg2: memref<8x128xf32, #tpu.memory_space<vmem>>, %arg3: memref<8x128xf32, #tpu.memory_space<vmem>>, %arg4: memref<128x256xf32, #tpu.memory_space<vmem>>, %arg5: memref<1x256xf32, #tpu.memory_space<vmem>>, %arg6: memref<8x128xf32, #tpu.memory_space<vmem>>) attributes {dimension_semantics = [#tpu.dimension_semantics<parallel>, #tpu.dimension_semantics<parallel>], iteration_bounds = array<i64: 1, 1>, scalar_prefetch = 0 : i64, scratch_operands = 0 : i64, tpu.core_type = #tpu.core_type<tc>, window_params = [{transform_indices = @transform_0, window_bounds = array<i64: 8, 128>}, {transform_indices = @transform_1, window_bounds = array<i64: 8, 128>}, {transform_indices = @transform_2, window_bounds = array<i64: 128, 256>}, {transform_indices = @transform_3, window_bounds = array<i64: 1, 256>}, {transform_indices = @transform_4, window_bounds = array<i64: 8, 128>}]} {
    %c0 = arith.constant 0 : index
    %c0_0 = arith.constant 0 : index
    %0 = vector.load %arg3[%c0, %c0_0] : memref<8x128xf32, #tpu.memory_space<vmem>>, vector<8x128xf32>
    %c0_1 = arith.constant 0 : index
    %c0_2 = arith.constant 0 : index
    %1 = vector.load %arg4[%c0_1, %c0_2] : memref<128x256xf32, #tpu.memory_space<vmem>>, vector<128x256xf32>
    %cst = arith.constant dense<0.000000e+00> : vector<8x256xf32>
    %2 = tpu.matmul %0, %1, %cst {dimension_numbers = #tpu.dot_dimension_numbers<[1], [0], [0], [1], [0, 0, 1, 1], [], []>} : vector<8x128xf32>, vector<128x256xf32>, vector<8x256xf32> -> vector<8x256xf32>
    %c0_3 = arith.constant 0 : index
    %c0_4 = arith.constant 0 : index
    %3 = vector.load %arg5[%c0_3, %c0_4] : memref<1x256xf32, #tpu.memory_space<vmem>>, vector<1x256xf32>
    %4 = vector.broadcast %3 : vector<1x256xf32> to vector<8x256xf32>
    %5 = arith.addf %2, %4 : vector<8x256xf32>
    %6 = vector.extract_strided_slice %5 {offsets = [0, 0], sizes = [8, 128], strides = [1, 1]} : vector<8x256xf32> to vector<8x128xf32>
    %7 = vector.extract_strided_slice %5 {offsets = [0, 128], sizes = [8, 128], strides = [1, 1]} : vector<8x256xf32> to vector<8x128xf32>
    %c0_5 = arith.constant 0 : index
    %c0_6 = arith.constant 0 : index
    %8 = vector.load %arg2[%c0_5, %c0_6] : memref<8x128xf32, #tpu.memory_space<vmem>>, vector<8x128xf32>
    %9 = arith.mulf %8, %6 : vector<8x128xf32>
    %10 = arith.addf %9, %7 : vector<8x128xf32>
    %c0_7 = arith.constant 0 : index
    %c0_8 = arith.constant 0 : index
    %11 = vector.load %arg6[%c0_7, %c0_8] : memref<8x128xf32, #tpu.memory_space<vmem>>, vector<8x128xf32>
    tpu.vector_store %arg6[%c0_7, %c0_8], %10 {strides = array<i32>} : memref<8x128xf32, #tpu.memory_space<vmem>>, vector<8x128xf32>,
    return
  }
  func.func @transform_0(%arg0: i32, %arg1: i32) -> (i32, i32) {
    %c0_i32 = arith.constant 0 : i32
    return %arg1, %arg0 : i32, i32
  }
  func.func @transform_1(%arg0: i32, %arg1: i32) -> (i32, i32) {
    %c0_i32 = arith.constant 0 : i32
    %c0_i32_0 = arith.constant 0 : i32
    return %arg1, %c0_i32 : i32, i32
  }
  func.func @transform_2(%arg0: i32, %arg1: i32) -> (i32, i32) {
    %c0_i32 = arith.constant 0 : i32
    %c0_i32_0 = arith.constant 0 : i32
    return %c0_i32, %arg0 : i32, i32
  }
  func.func @transform_3(%arg0: i32, %arg1: i32) -> (i32, i32) {
    %c0_i32 = arith.constant 0 : i32
    %c0_i32_0 = arith.constant 0 : i32
    return %c0_i32, %arg0 : i32, i32
  }
  func.func @transform_4(%arg0: i32, %arg1: i32) -> (i32, i32) {
    %c0_i32 = arith.constant 0 : i32
    return %arg1, %arg0 : i32, i32
  }
}

</mosaic_0001>

<bundles_post_ra>
// kernel: tpu_custom_call.1
= control target key start
LH: loop header
LB: loop body
LE: loop exit
PB: predicated region body
PF: predicated region fallthrough
CT: control target
= control target key end

     0   :  { %9 = vsyncpa [#allocation3], 0  ;;  %s407_s0 = inlined_call_operand.hbm [shape: f32[8,128], index: 0, kind: input, shape index: {}]   ;;  %s408_s1 = inlined_call_operand.hbm [shape: f32[8,128], index: 1, kind: input, shape index: {}]   ;;  %s409_s2 = inlined_call_operand.hbm [shape: f32[128,256], index: 2, kind: input, shape index: {}]   ;;  %s410_s3 = inlined_call_operand.vmem [shape: f32[1,256], index: 3, kind: input, shape index: {}]   ;;  %s411_s4 = inlined_call_operand.hbm [shape: f32[8,128], index: 4, kind: output, shape index: {}]  }
   0x1   :  { %10 = vsyncpa [#allocation6], 0 }
   0x2   :  { %11 = vsyncpa [#allocation4], 0  ;;  %s324_s15 = smov [#allocation5]   ;;  %s325_s17 = smov [#allocation2]  }
   0x3   :  { %s28_s16 = sshll.u32 %s324_s15, 4  ;;  %s18_s18 = sshll.u32 %s325_s17, 4  ;;  %s29_s16 = int_to_ptr.vmem [resolvable:$true] %s28_s16  ;;  %s19_s18 = int_to_ptr.vmem [resolvable:$true] %s18_s18 }
   0x4   :  { %s230_s21 = scalar_lea.hbm %s408_s1, 128 }
   0x5   :  { %p231_p0 = scmp.ne.s32.totalorder %s408_s1, %s230_s21  ;;  %p234_p1 = scmp.lt.u32.totalorder %s230_s21, %s408_s1 }
   0x7   :  { %p236_p2 = pnand %p234_p1, %p231_p0 }
   0x9   :  { %239 = shalt.err (!%p236_p2)
}
   0xa   :  { %s240_s26 = scalar_lea.vmem %s29_s16, 128  ;;  %p245_p4 = scmp.lt.s32.totalorder %s29_s16, %s29_s16 }
   0xb   :  { %p241_p3 = scmp.ne.s32.totalorder %s29_s16, %s240_s26  ;;  %p246_p5 = scmp.lt.s32.totalorder %s240_s26, %s240_s26 }
   0xd   :  { %p247_p6 = por %p246_p5, %p245_p4 }
   0xf   :  { %p248_p7 = pnand %p247_p6, %p241_p3 }
  0x11   :  { %251 = shalt.err (!%p248_p7)
}
  0x12   :  { %31 = dma.hbm_to_vmem [thread:$0]  %s408_s1, 128, %s29_s16, [#allocation6]  }
  0x13   :  { %s252_s5 = scalar_lea.hbm %s407_s0, 128 }
  0x14   :  { %p253_p8 = scmp.ne.s32.totalorder %s407_s0, %s252_s5  ;;  %p256_p9 = scmp.lt.u32.totalorder %s252_s5, %s407_s0 }
  0x16   :  { %p258_p10 = pnand %p256_p9, %p253_p8 }
  0x18   :  { %261 = shalt.err (!%p258_p10)
}
  0x19   :  { %s262_s10 = scalar_lea.vmem %s19_s18, 128  ;;  %p267_p12 = scmp.lt.s32.totalorder %s19_s18, %s19_s18 }
  0x1a   :  { %p263_p11 = scmp.ne.s32.totalorder %s19_s18, %s262_s10  ;;  %p268_p13 = scmp.lt.s32.totalorder %s262_s10, %s262_s10 }
  0x1c   :  { %p269_p0 = por %p268_p13, %p267_p12 }
  0x1e   :  { %p270_p1 = pnand %p269_p0, %p263_p11 }
  0x20   :  { %273 = shalt.err (!%p270_p1)
}
  0x21   :  { %21 = dma.hbm_to_vmem [thread:$0]  %s407_s0, 128, %s19_s18, [#allocation3]  }
  0x22   :  { %s326_s12 = smov [#allocation7]   ;;  %s274_s16 = scalar_lea.hbm %s409_s2, 4096 }
  0x23   :  { %s37_s13 = sshll.u32 %s326_s12, 4  ;;  %p275_p2 = scmp.ne.s32.totalorder %s409_s2, %s274_s16  ;;  %s38_s13 = int_to_ptr.vmem [resolvable:$true] %s37_s13 }
  0x24   :  { %p278_p3 = scmp.lt.u32.totalorder %s274_s16, %s409_s2 }
  0x26   :  { %p280_p4 = pnand %p278_p3, %p275_p2 }
  0x28   :  { %283 = shalt.err (!%p280_p4)
}
  0x29   :  { %s284_s22 = scalar_lea.vmem %s38_s13, 4096  ;;  %p289_p6 = scmp.lt.s32.totalorder %s38_s13, %s38_s13 }
  0x2a   :  { %p285_p5 = scmp.ne.s32.totalorder %s38_s13, %s284_s22  ;;  %p290_p7 = scmp.lt.s32.totalorder %s284_s22, %s284_s22 }
  0x2c   :  { %p291_p8 = por %p290_p7, %p289_p6 }
  0x2e   :  { %p292_p9 = pnand %p291_p8, %p285_p5 }
  0x30   :  { %295 = shalt.err (!%p292_p9)
}
  0x31   :  { %s327_s0 = smov 256   ;;  %s328_s18 = smov 16  }
  0x32   :  { %43 = dma.hbm_to_vmem [thread:$0]  %s409_s2, 4096, %s38_s13, [#allocation6], %s327_s0, %s327_s0, %s328_s18  }
  0x33   :  { %318 = dma.done.wait [#allocation3], 128  }
  0x34   :  { %319 = vsyncadd [#allocation3], 4294967168 }
  0x35   :  { %320 = dma.done.wait [#allocation6], 4224  }
  0x36   :  { %321 = vsyncadd [#allocation6], 4294963072  ;;  %v329_v0 = vmov 0.0   ;;  %v57_v1 = vld [vmem:[#allocation7 + $0x8] sm:$0xff]  ;;  %v59_v2 = vld [vmem:[#allocation7 + $0x18] sm:$0xff]  ;;  %v90_v50 = vlaneseq  ;;  %s330_s26 = smov [#allocation8]  }
  0x37   :  { %164 = vmatprep.mubr.f32.mxu0 %v329_v0  ;;  %v56_v3 = vld [vmem:[#allocation7] sm:$0xff]  ;;  %v191_v4 = vpack.c.bf16 %v59_v2, %v57_v1  ;;  %v58_v5 = vld [vmem:[#allocation7 + $0x10] sm:$0xff]  ;;  %v61_v6 = vld [vmem:[#allocation7 + $0x28] sm:$0xff]  ;;  %s181_s27 = sshll.u32 %s330_s26, 4  ;;  %s182_s27 = int_to_ptr.vmem [resolvable:$true] %s181_s27 }
  0x38   :  { %v63_v7 = vld [vmem:[#allocation7 + $0x38] sm:$0xff]  ;;  %v193_v8 = vpack.c.bf16 %v58_v5, %v56_v3  ;;  %v60_v10 = vld [vmem:[#allocation7 + $0x20] sm:$0xff]  ;;  %v62_v11 = vld [vmem:[#allocation7 + $0x30] sm:$0xff]  ;;  %v91_v51 = vshrl.u32 %v90_v50, 7  ;;  %s296_s28 = scalar_lea.vmem %s182_s27, 128  ;;  %p301_p11 = scmp.lt.s32.totalorder %s182_s27, %s182_s27 }
  0x39   :  { %v195_v9 = vpack.c.bf16 %v63_v7, %v61_v6  ;;  %v65_v12 = vld [vmem:[#allocation7 + $0x48] sm:$0xff]  ;;  %192 = vmatprep.subr.bf16.mxu0 %v191_v4  ;;  %v67_v13 = vld [vmem:[#allocation7 + $0x58] sm:$0xff]  ;;  %v197_v14 = vpack.c.bf16 %v62_v11, %v60_v10  ;;  %v64_v16 = vld [vmem:[#allocation7 + $0x40] sm:$0xff]  ;;  %p297_p10 = scmp.ne.s32.totalorder %s182_s27, %s296_s28  ;;  %p302_p12 = scmp.lt.s32.totalorder %s296_s28, %s296_s28 }
  0x3a   :  { %194 = vmatpush1.bf16.msra.mxu0 %v193_v8  ;;  %v199_v15 = vpack.c.bf16 %v67_v13, %v65_v12  ;;  %v66_v17 = vld [vmem:[#allocation7 + $0x50] sm:$0xff]  ;;  %v69_v18 = vld [vmem:[#allocation7 + $0x68] sm:$0xff]  ;;  %v71_v19 = vld [vmem:[#allocation7 + $0x78] sm:$0xff]  ;;  %v92_v52 = vsub.s32 0, %v91_v51  ;;  %v96_v54 = vsub.s32 1, %v91_v51 }
  0x3b   :  { %196 = vmatprep.subr.bf16.mxu0 %v195_v9  ;;  %v201_v20 = vpack.c.bf16 %v66_v17, %v64_v16  ;;  %v203_v21 = vpack.c.bf16 %v71_v19, %v69_v18  ;;  %v68_v22 = vld [vmem:[#allocation7 + $0x60] sm:$0xff]  ;;  %v70_v23 = vld [vmem:[#allocation7 + $0x70] sm:$0xff]  ;;  %v73_v24 = vld [vmem:[#allocation7 + $0x88] sm:$0xff]  ;;  %p303_p13 = por %p302_p12, %p301_p11 }
  0x3c   :  { %v75_v25 = vld [vmem:[#allocation7 + $0x98] sm:$0xff]  ;;  %v205_v26 = vpack.c.bf16 %v70_v23, %v68_v22  ;;  %v72_v28 = vld [vmem:[#allocation7 + $0x80] sm:$0xff]  ;;  %v74_v29 = vld [vmem:[#allocation7 + $0x90] sm:$0xff] }
  0x3d   :  { %v207_v27 = vpack.c.bf16 %v75_v25, %v73_v24  ;;  %v77_v30 = vld [vmem:[#allocation7 + $0xa8] sm:$0xff]  ;;  %v79_v31 = vld [vmem:[#allocation7 + $0xb8] sm:$0xff]  ;;  %v209_v32 = vpack.c.bf16 %v74_v29, %v72_v28  ;;  %v76_v34 = vld [vmem:[#allocation7 + $0xa0] sm:$0xff]  ;;  %p304_p0 = pnand %p303_p13, %p297_p10 }
  0x3e   :  { %198 = vmatpush1.bf16.msra.mxu0 %v197_v14  ;;  %v211_v33 = vpack.c.bf16 %v79_v31, %v77_v30  ;;  %v78_v35 = vld [vmem:[#allocation7 + $0xb0] sm:$0xff]  ;;  %v81_v36 = vld [vmem:[#allocation7 + $0xc8] sm:$0xff]  ;;  %v83_v37 = vld [vmem:[#allocation7 + $0xd8] sm:$0xff] }
  0x3f   :  { %200 = vmatprep.subr.bf16.mxu0 %v199_v15  ;;  %v213_v38 = vpack.c.bf16 %v78_v35, %v76_v34  ;;  %v215_v39 = vpack.c.bf16 %v83_v37, %v81_v36  ;;  %v80_v40 = vld [vmem:[#allocation7 + $0xc0] sm:$0xff]  ;;  %v82_v41 = vld [vmem:[#allocation7 + $0xd0] sm:$0xff]  ;;  %v85_v42 = vld [vmem:[#allocation7 + $0xe8] sm:$0xff] }
  0x40   :  { %v87_v43 = vld [vmem:[#allocation7 + $0xf8] sm:$0xff]  ;;  %v217_v44 = vpack.c.bf16 %v82_v41, %v80_v40  ;;  %v84_v46 = vld [vmem:[#allocation7 + $0xe0] sm:$0xff]  ;;  %v86_v47 = vld [vmem:[#allocation7 + $0xf0] sm:$0xff] }
  0x41   :  { %v219_v45 = vpack.c.bf16 %v87_v43, %v85_v42  ;;  %v221_v48 = vpack.c.bf16 %v86_v47, %v84_v46  ;;  %v55_v49 = vld [vmem:[#allocation5] sm:$0xff]  ;;  %v88_v53 = vld [vmem:[%s410_s3] sm:$0x3] }
  0x42   :  { %202 = vmatpush1.bf16.msra.mxu0 %v201_v20  ;;  %v93_v55 = vrot.slane %v88_v53, %v92_v52  ;;  %v97_v56 = vrot.slane %v88_v53, %v96_v54  ;;  %v171_v58 = vld [vmem:[#allocation2] sm:$0xff] }
  0x43   :  { %204 = vmatprep.subr.bf16.mxu0 %v203_v21 }
  0x46   :  { %206 = vmatpush1.bf16.msra.mxu0 %v205_v26 }
  0x47   :  { %208 = vmatprep.subr.bf16.mxu0 %v207_v27 }
  0x4a   :  { %210 = vmatpush1.bf16.msra.mxu0 %v209_v32 }
  0x4b   :  { %212 = vmatprep.subr.bf16.mxu0 %v211_v33 }
  0x4e   :  { %214 = vmatpush1.bf16.msra.mxu0 %v213_v38 }
  0x4f   :  { %216 = vmatprep.subr.bf16.mxu0 %v215_v39 }
  0x52   :  { %218 = vmatpush1.bf16.msra.mxu0 %v217_v44 }
  0x53   :  { %220 = vmatprep.subr.bf16.mxu0 %v219_v45 }
  0x56   :  { %222 = vmatpush1.bf16.msra.mxu0 %v221_v48 }
  0x59   :  { %165 = vmatmul.mubr.f32.vlgmr.msra.gmra.mrb[0].mxu0 %v55_v49 }
 0x12c   :  { %v166_v57 = vpop.f32.mrb[0].mxu0 }
 0x12d   :  { %v167_v59 = vadd.f32 %v166_v57, %v93_v55  ;;  %v168_v60 = vpop.f32.mrb[1].mxu0 }
 0x12e   :  { %v169_v61 = vadd.f32 %v168_v60, %v97_v56 }
 0x12f   :  { %v172_v62 = vmul.f32 %v171_v58, %v167_v59 }
 0x131   :  { %v173_v63 = vadd.f32 %v172_v62, %v169_v61 }
 0x133   :  { %174 = vst [vmem:[#allocation8] sm:$0xff] %v173_v63 }
 0x134   :  { %307 = shalt.err (!%p304_p0)
}
 0x135   :  { %s308_s30 = scalar_lea.hbm %s411_s4, 128 }
 0x136   :  { %p309_p1 = scmp.ne.s32.totalorder %s411_s4, %s308_s30  ;;  %p312_p2 = scmp.lt.u32.totalorder %s308_s30, %s411_s4 }
 0x138   :  { %p314_p3 = pnand %p312_p2, %p309_p1 }
 0x13a   :  { %317 = shalt.err (!%p314_p3)
}
 0x13b   :  { %184 = dma.vmem_to_hbm [thread:$0]  %s182_s27, 128, %s411_s4, [#allocation4]  }
 0x13c   :  { %322 = dma.done.wait [#allocation4], 128  }
 0x13d   :  { %323 = vsyncadd [#allocation4], 4294967168 }
 0x13e   :  { %188 = vsyncpa [#allocation3], 1 }
 0x13f   :  { %189 = vsyncpa [#allocation6], 1 }
 0x140   :  { %190 = vsyncpa [#allocation4], 1 }

// kernel: tpu_custom_call.1
= control target key start
LH: loop header
LB: loop body
LE: loop exit
PB: predicated region body
PF: predicated region fallthrough
CT: control target
= control target key end

     0   :  { %9 = vsyncpa [#allocation3], 0  ;;  %s407_s0 = inlined_call_operand.hbm [shape: f32[8,128], index: 0, kind: input, shape index: {}]   ;;  %s408_s1 = inlined_call_operand.hbm [shape: f32[8,128], index: 1, kind: input, shape index: {}]   ;;  %s409_s2 = inlined_call_operand.hbm [shape: f32[128,256], index: 2, kind: input, shape index: {}]   ;;  %s410_s3 = inlined_call_operand.vmem [shape: f32[1,256], index: 3, kind: input, shape index: {}]   ;;  %s411_s4 = inlined_call_operand.hbm [shape: f32[8,128], index: 4, kind: output, shape index: {}]  }
   0x1   :  { %10 = vsyncpa [#allocation6], 0 }
   0x2   :  { %11 = vsyncpa [#allocation4], 0  ;;  %s324_s15 = smov [#allocation5]   ;;  %s325_s17 = smov [#allocation2]  }
   0x3   :  { %s28_s16 = sshll.u32 %s324_s15, 4  ;;  %s18_s18 = sshll.u32 %s325_s17, 4  ;;  %s29_s16 = int_to_ptr.vmem [resolvable:$true] %s28_s16  ;;  %s19_s18 = int_to_ptr.vmem [resolvable:$true] %s18_s18 }
   0x4   :  { %s230_s21 = scalar_lea.hbm %s408_s1, 128 }
   0x5   :  { %p231_p0 = scmp.ne.s32.totalorder %s408_s1, %s230_s21  ;;  %p234_p1 = scmp.lt.u32.totalorder %s230_s21, %s408_s1 }
   0x7   :  { %p236_p2 = pnand %p234_p1, %p231_p0 }
   0x9   :  { %239 = shalt.err (!%p236_p2)
}
   0xa   :  { %s240_s26 = scalar_lea.vmem %s29_s16, 128  ;;  %p245_p4 = scmp.lt.s32.totalorder %s29_s16, %s29_s16 }
   0xb   :  { %p241_p3 = scmp.ne.s32.totalorder %s29_s16, %s240_s26  ;;  %p246_p5 = scmp.lt.s32.totalorder %s240_s26, %s240_s26 }
   0xd   :  { %p247_p6 = por %p246_p5, %p245_p4 }
   0xf   :  { %p248_p7 = pnand %p247_p6, %p241_p3 }
  0x11   :  { %251 = shalt.err (!%p248_p7)
}
  0x12   :  { %31 = dma.hbm_to_vmem [thread:$0]  %s408_s1, 128, %s29_s16, [#allocation6]  }
  0x13   :  { %s252_s5 = scalar_lea.hbm %s407_s0, 128 }
  0x14   :  { %p253_p8 = scmp.ne.s32.totalorder %s407_s0, %s252_s5  ;;  %p256_p9 = scmp.lt.u32.totalorder %s252_s5, %s407_s0 }
  0x16   :  { %p258_p10 = pnand %p256_p9, %p253_p8 }
  0x18   :  { %261 = shalt.err (!%p258_p10)
}
  0x19   :  { %s262_s10 = scalar_lea.vmem %s19_s18, 128  ;;  %p267_p12 = scmp.lt.s32.totalorder %s19_s18, %s19_s18 }
  0x1a   :  { %p263_p11 = scmp.ne.s32.totalorder %s19_s18, %s262_s10  ;;  %p268_p13 = scmp.lt.s32.totalorder %s262_s10, %s262_s10 }
  0x1c   :  { %p269_p0 = por %p268_p13, %p267_p12 }
  0x1e   :  { %p270_p1 = pnand %p269_p0, %p263_p11 }
  0x20   :  { %273 = shalt.err (!%p270_p1)
}
  0x21   :  { %21 = dma.hbm_to_vmem [thread:$0]  %s407_s0, 128, %s19_s18, [#allocation3]  }
  0x22   :  { %s326_s12 = smov [#allocation7]   ;;  %s274_s16 = scalar_lea.hbm %s409_s2, 4096 }
  0x23   :  { %s37_s13 = sshll.u32 %s326_s12, 4  ;;  %p275_p2 = scmp.ne.s32.totalorder %s409_s2, %s274_s16  ;;  %s38_s13 = int_to_ptr.vmem [resolvable:$true] %s37_s13 }
  0x24   :  { %p278_p3 = scmp.lt.u32.totalorder %s274_s16, %s409_s2 }
  0x26   :  { %p280_p4 = pnand %p278_p3, %p275_p2 }
  0x28   :  { %283 = shalt.err (!%p280_p4)
}
  0x29   :  { %s284_s22 = scalar_lea.vmem %s38_s13, 4096  ;;  %p289_p6 = scmp.lt.s32.totalorder %s38_s13, %s38_s13 }
  0x2a   :  { %p285_p5 = scmp.ne.s32.totalorder %s38_s13, %s284_s22  ;;  %p290_p7 = scmp.lt.s32.totalorder %s284_s22, %s284_s22 }
  0x2c   :  { %p291_p8 = por %p290_p7, %p289_p6 }
  0x2e   :  { %p292_p9 = pnand %p291_p8, %p285_p5 }
  0x30   :  { %295 = shalt.err (!%p292_p9)
}
  0x31   :  { %s327_s0 = smov 256   ;;  %s328_s18 = smov 16  }
  0x32   :  { %43 = dma.hbm_to_vmem [thread:$0]  %s409_s2, 4096, %s38_s13, [#allocation6], %s327_s0, %s327_s0, %s328_s18  }
  0x33   :  { %318 = dma.done.wait [#allocation3], 128  }
  0x34   :  { %319 = vsyncadd [#allocation3], 4294967168 }
  0x35   :  { %320 = dma.done.wait [#allocation6], 4224  }
  0x36   :  { %321 = vsyncadd [#allocation6], 4294963072  ;;  %v329_v0 = vmov 0.0   ;;  %v57_v1 = vld [vmem:[#allocation7 + $0x8] sm:$0xff]  ;;  %v59_v2 = vld [vmem:[#allocation7 + $0x18] sm:$0xff]  ;;  %v90_v50 = vlaneseq  ;;  %s330_s26 = smov [#allocation8]  }
  0x37   :  { %164 = vmatprep.mubr.f32.mxu0 %v329_v0  ;;  %v56_v3 = vld [vmem:[#allocation7] sm:$0xff]  ;;  %v191_v4 = vpack.c.bf16 %v59_v2, %v57_v1  ;;  %v58_v5 = vld [vmem:[#allocation7 + $0x10] sm:$0xff]  ;;  %v61_v6 = vld [vmem:[#allocation7 + $0x28] sm:$0xff]  ;;  %s181_s27 = sshll.u32 %s330_s26, 4  ;;  %s182_s27 = int_to_ptr.vmem [resolvable:$true] %s181_s27 }
  0x38   :  { %v63_v7 = vld [vmem:[#allocation7 + $0x38] sm:$0xff]  ;;  %v193_v8 = vpack.c.bf16 %v58_v5, %v56_v3  ;;  %v60_v10 = vld [vmem:[#allocation7 + $0x20] sm:$0xff]  ;;  %v62_v11 = vld [vmem:[#allocation7 + $0x30] sm:$0xff]  ;;  %v91_v51 = vshrl.u32 %v90_v50, 7  ;;  %s296_s28 = scalar_lea.vmem %s182_s27, 128  ;;  %p301_p11 = scmp.lt.s32.totalorder %s182_s27, %s182_s27 }
  0x39   :  { %v195_v9 = vpack.c.bf16 %v63_v7, %v61_v6  ;;  %v65_v12 = vld [vmem:[#allocation7 + $0x48] sm:$0xff]  ;;  %192 = vmatprep.subr.bf16.mxu0 %v191_v4  ;;  %v67_v13 = vld [vmem:[#allocation7 + $0x58] sm:$0xff]  ;;  %v197_v14 = vpack.c.bf16 %v62_v11, %v60_v10  ;;  %v64_v16 = vld [vmem:[#allocation7 + $0x40] sm:$0xff]  ;;  %p297_p10 = scmp.ne.s32.totalorder %s182_s27, %s296_s28  ;;  %p302_p12 = scmp.lt.s32.totalorder %s296_s28, %s296_s28 }
  0x3a   :  { %194 = vmatpush1.bf16.msra.mxu0 %v193_v8  ;;  %v199_v15 = vpack.c.bf16 %v67_v13, %v65_v12  ;;  %v66_v17 = vld [vmem:[#allocation7 + $0x50] sm:$0xff]  ;;  %v69_v18 = vld [vmem:[#allocation7 + $0x68] sm:$0xff]  ;;  %v71_v19 = vld [vmem:[#allocation7 + $0x78] sm:$0xff]  ;;  %v92_v52 = vsub.s32 0, %v91_v51  ;;  %v96_v54 = vsub.s32 1, %v91_v51 }
  0x3b   :  { %196 = vmatprep.subr.bf16.mxu0 %v195_v9  ;;  %v201_v20 = vpack.c.bf16 %v66_v17, %v64_v16  ;;  %v203_v21 = vpack.c.bf16 %v71_v19, %v69_v18  ;;  %v68_v22 = vld [vmem:[#allocation7 + $0x60] sm:$0xff]  ;;  %v70_v23 = vld [vmem:[#allocation7 + $0x70] sm:$0xff]  ;;  %v73_v24 = vld [vmem:[#allocation7 + $0x88] sm:$0xff]  ;;  %p303_p13 = por %p302_p12, %p301_p11 }
  0x3c   :  { %v75_v25 = vld [vmem:[#allocation7 + $0x98] sm:$0xff]  ;;  %v205_v26 = vpack.c.bf16 %v70_v23, %v68_v22  ;;  %v72_v28 = vld [vmem:[#allocation7 + $0x80] sm:$0xff]  ;;  %v74_v29 = vld [vmem:[#allocation7 + $0x90] sm:$0xff] }
  0x3d   :  { %v207_v27 = vpack.c.bf16 %v75_v25, %v73_v24  ;;  %v77_v30 = vld [vmem:[#allocation7 + $0xa8] sm:$0xff]  ;;  %v79_v31 = vld [vmem:[#allocation7 + $0xb8] sm:$0xff]  ;;  %v209_v32 = vpack.c.bf16 %v74_v29, %v72_v28  ;;  %v76_v34 = vld [vmem:[#allocation7 + $0xa0] sm:$0xff]  ;;  %p304_p0 = pnand %p303_p13, %p297_p10 }
  0x3e   :  { %198 = vmatpush1.bf16.msra.mxu0 %v197_v14  ;;  %v211_v33 = vpack.c.bf16 %v79_v31, %v77_v30  ;;  %v78_v35 = vld [vmem:[#allocation7 + $0xb0] sm:$0xff]  ;;  %v81_v36 = vld [vmem:[#allocation7 + $0xc8] sm:$0xff]  ;;  %v83_v37 = vld [vmem:[#allocation7 + $0xd8] sm:$0xff] }
  0x3f   :  { %200 = vmatprep.subr.bf16.mxu0 %v199_v15  ;;  %v213_v38 = vpack.c.bf16 %v78_v35, %v76_v34  ;;  %v215_v39 = vpack.c.bf16 %v83_v37, %v81_v36  ;;  %v80_v40 = vld [vmem:[#allocation7 + $0xc0] sm:$0xff]  ;;  %v82_v41 = vld [vmem:[#allocation7 + $0xd0] sm:$0xff]  ;;  %v85_v42 = vld [vmem:[#allocation7 + $0xe8] sm:$0xff] }
  0x40   :  { %v87_v43 = vld [vmem:[#allocation7 + $0xf8] sm:$0xff]  ;;  %v217_v44 = vpack.c.bf16 %v82_v41, %v80_v40  ;;  %v84_v46 = vld [vmem:[#allocation7 + $0xe0] sm:$0xff]  ;;  %v86_v47 = vld [vmem:[#allocation7 + $0xf0] sm:$0xff] }
  0x41   :  { %v219_v45 = vpack.c.bf16 %v87_v43, %v85_v42  ;;  %v221_v48 = vpack.c.bf16 %v86_v47, %v84_v46  ;;  %v55_v49 = vld [vmem:[#allocation5] sm:$0xff]  ;;  %v88_v53 = vld [vmem:[%s410_s3] sm:$0x3] }
  0x42   :  { %202 = vmatpush1.bf16.msra.mxu0 %v201_v20  ;;  %v93_v55 = vrot.slane %v88_v53, %v92_v52  ;;  %v97_v56 = vrot.slane %v88_v53, %v96_v54  ;;  %v171_v58 = vld [vmem:[#allocation2] sm:$0xff] }
  0x43   :  { %204 = vmatprep.subr.bf16.mxu0 %v203_v21 }
  0x46   :  { %206 = vmatpush1.bf16.msra.mxu0 %v205_v26 }
  0x47   :  { %208 = vmatprep.subr.bf16.mxu0 %v207_v27 }
  0x4a   :  { %210 = vmatpush1.bf16.msra.mxu0 %v209_v32 }
  0x4b   :  { %212 = vmatprep.subr.bf16.mxu0 %v211_v33 }
  0x4e   :  { %214 = vmatpush1.bf16.msra.mxu0 %v213_v38 }
  0x4f   :  { %216 = vmatprep.subr.bf16.mxu0 %v215_v39 }
  0x52   :  { %218 = vmatpush1.bf16.msra.mxu0 %v217_v44 }
  0x53   :  { %220 = vmatprep.subr.bf16.mxu0 %v219_v45 }
  0x56   :  { %222 = vmatpush1.bf16.msra.mxu0 %v221_v48 }
  0x59   :  { %165 = vmatmul.mubr.f32.vlgmr.msra.gmra.mrb[0].mxu0 %v55_v49 }
 0x12c   :  { %v166_v57 = vpop.f32.mrb[0].mxu0 }
 0x12d   :  { %v167_v59 = vadd.f32 %v166_v57, %v93_v55  ;;  %v168_v60 = vpop.f32.mrb[1].mxu0 }
 0x12e   :  { %v169_v61 = vadd.f32 %v168_v60, %v97_v56 }
 0x12f   :  { %v172_v62 = vmul.f32 %v171_v58, %v167_v59 }
 0x131   :  { %v173_v63 = vadd.f32 %v172_v62, %v169_v61 }
 0x133   :  { %174 = vst [vmem:[#allocation8] sm:$0xff] %v173_v63 }
 0x134   :  { %307 = shalt.err (!%p304_p0)
}
 0x135   :  { %s308_s30 = scalar_lea.hbm %s411_s4, 128 }
 0x136   :  { %p309_p1 = scmp.ne.s32.totalorder %s411_s4, %s308_s30  ;;  %p312_p2 = scmp.lt.u32.totalorder %s308_s30, %s411_s4 }
 0x138   :  { %p314_p3 = pnand %p312_p2, %p309_p1 }
 0x13a   :  { %317 = shalt.err (!%p314_p3)
}
 0x13b   :  { %184 = dma.vmem_to_hbm [thread:$0]  %s182_s27, 128, %s411_s4, [#allocation4]  }
 0x13c   :  { %322 = dma.done.wait [#allocation4], 128  }
 0x13d   :  { %323 = vsyncadd [#allocation4], 4294967168 }
 0x13e   :  { %188 = vsyncpa [#allocation3], 1 }
 0x13f   :  { %189 = vsyncpa [#allocation6], 1 }
 0x140   :  { %190 = vsyncpa [#allocation4], 1 }

</bundles_post_ra>
